<compile_context>
chip_gen: v5e
topology: v5e:2x2
jax: 0.10.0
libtpu: 0.0.40
codegen_flags: <defaults>
</compile_context>

<pallas_src>
import functools

import jax
import jax.numpy as jnp
from jax import lax
from jax.experimental import pallas as pl
from jax.experimental.pallas import tpu as pltpu


_LANE = 128     # last dim padded to a multiple of the 128-lane vreg width
_SUBLANE = 8    # f32 sublane height: rows padded to a multiple of 8


def _round_up(n, m):
    return ((n + m - 1) // m) * m


def _keep_mask(seed_i32, shape):
    """Bernoulli(0.5) keep-mask from a counter-based hash.

    Pure jnp integer ops -> lowers on Mosaic TPU and in interpret mode alike.
    Uses the high bit of a SplitMix32-style avalanche of (seed, element idx).
    """
    rows = lax.broadcasted_iota(jnp.uint32, shape, 0)
    cols = lax.broadcasted_iota(jnp.uint32, shape, 1)
    x = rows * jnp.uint32(shape[1]) + cols
    x = x + seed_i32.astype(jnp.uint32) * jnp.uint32(0x9E3779B9)
    x = (x ^ (x >> jnp.uint32(16))) * jnp.uint32(0x7FEB352D)
    x = (x ^ (x >> jnp.uint32(15))) * jnp.uint32(0x846CA68B)
    x = x ^ (x >> jnp.uint32(16))
    return (x >> jnp.uint32(31)) == jnp.uint32(0)    # P(keep) = 0.5


def _prenet_fused_kernel(num_layers, seed_ref, *refs):
    """Fused Prenet: (linear -> relu -> dropout(p=0.5)) x num_layers.

    seed_ref : SMEM (num_layers,) int32 -- per-layer dropout seed
    refs     : x_ref, w0_ref, ..., w{L-1}_ref, o_ref (all VMEM, lane-padded)
               weights are pre-transposed: (Din_pad, Dout_pad)
    """
    x_ref = refs[0]
    w_refs = refs[1:1 + num_layers]
    o_ref = refs[1 + num_layers]

    h = x_ref[...]
    for l, w_ref in enumerate(w_refs):
        # MXU matmul with f32 accumulation (K, N are 128-aligned).
        y = jnp.dot(h, w_ref[...], preferred_element_type=jnp.float32)
        y = jnp.maximum(y, 0.0)                       # ReLU (VPU)
        keep = _keep_mask(seed_ref[l], y.shape)       # dropout mask (int VPU ops)
        h = jnp.where(keep, y * 2.0, 0.0)             # scale kept by 1/(1-p) = 2
    o_ref[...] = h.astype(o_ref.dtype)


def _prenet_forward(x, weights_t_pad, seeds, out_dim):
    """Pad -> fused Pallas kernel -> slice.  Designed to run under jax.jit."""
    B, Din = x.shape
    num_layers = len(weights_t_pad)
    Bp = _round_up(B, _SUBLANE)
    Din_pad = weights_t_pad[0].shape[0]
    Dout_pad = weights_t_pad[-1].shape[1]

    x_pad = jnp.zeros((Bp, Din_pad), x.dtype).at[:B, :Din].set(x)

    in_specs = [pl.BlockSpec(memory_space=pltpu.MemorySpace.SMEM)]   # seeds
    in_specs.append(pl.BlockSpec((Bp, Din_pad), lambda: (0, 0)))     # x
    for w in weights_t_pad:
        in_specs.append(pl.BlockSpec(w.shape, lambda: (0, 0)))       # weights

    out_pad = pl.pallas_call(
        functools.partial(_prenet_fused_kernel, num_layers),
        out_shape=jax.ShapeDtypeStruct((Bp, Dout_pad), x.dtype),
        in_specs=in_specs,
        out_specs=pl.BlockSpec((Bp, Dout_pad), lambda: (0, 0)),
    )(seeds, x_pad, *weights_t_pad)

    return out_pad[:B, :out_dim]


_prenet_forward_jit = jax.jit(_prenet_forward, static_argnums=(3,))


def _prenet_reference(x, weights_t_pad, seeds, out_dim):
    """Pure-JAX reference with identical padded layout and hash-based dropout."""
    B, Din = x.shape
    Bp = _round_up(B, _SUBLANE)
    Din_pad = weights_t_pad[0].shape[0]
    h = jnp.zeros((Bp, Din_pad), jnp.float32).at[:B, :Din].set(x)
    for l, w in enumerate(weights_t_pad):
        y = jnp.dot(h, w, preferred_element_type=jnp.float32,
                    precision=lax.Precision.HIGHEST)
        y = jnp.maximum(y, 0.0)
        keep = _keep_mask(seeds[l], y.shape)
        h = jnp.where(keep, y * 2.0, 0.0)
    return h[:B, :out_dim]


class Prenet:
    """JAX/Pallas port of the msa_tts Prenet (bias-free Linear+ReLU+dropout stack).

    Dropout is ALWAYS active (training=True), matching the PyTorch module.
    Callers should vary `seed` across forward passes to get i.i.d. masks.
    """

    def __init__(self, in_dim, sizes, key):
        self.in_dim = in_dim
        self.sizes = list(sizes)
        self.num_layers = len(self.sizes)
        in_sizes = [in_dim] + self.sizes[:-1]
        weights_t_pad = []
        for din, dout in zip(in_sizes, self.sizes):
            key, sub = jax.random.split(key)
            # Xavier-uniform (gain for 'linear' = 1.0), matching LinearNorm init.
            limit = (6.0 / (din + dout)) ** 0.5
            w = jax.random.uniform(sub, (dout, din), jnp.float32, -limit, limit)
            # Pre-transpose to (Din, Dout) and zero-pad both dims to 128 lanes.
            w_t_pad = jnp.zeros(
                (_round_up(din, _LANE), _round_up(dout, _LANE)), jnp.float32
            ).at[:din, :dout].set(w.T)
            weights_t_pad.append(w_t_pad)
        self.weights_t_pad = tuple(weights_t_pad)

    def __call__(self, x, seed=0):
        # One seed per layer; vary `seed` per step for i.i.d. dropout masks.
        seeds = jnp.int32(seed) + jnp.arange(self.num_layers, dtype=jnp.int32)
        return _prenet_forward_jit(x, self.weights_t_pad, seeds, self.sizes[-1])


if __name__ == "__main__":
    key = jax.random.PRNGKey(0)
    key, k_in, k_params = jax.random.split(key, 3)

    batch = 8
    in_dim = 32
    sizes = [64, 32]

    x = jax.random.normal(k_in, (batch, in_dim), jnp.float32)
    prenet = Prenet(in_dim, sizes, k_params)

    out = prenet(x, seed=1234)
    out = jax.block_until_ready(out)

    assert out.shape == (batch, sizes[-1]), out.shape
    assert out.dtype == jnp.float32

    # relu + dropout -> non-negative, with a substantial fraction exactly zero.
    assert bool(jnp.all(out >= 0.0))
    zero_frac = float(jnp.mean((out == 0.0).astype(jnp.float32)))
    assert 0.25 < zero_frac < 0.95, zero_frac

    # Cross-check against a pure-JAX reference using the same hash-based mask.
    seeds = jnp.int32(1234) + jnp.arange(len(sizes), dtype=jnp.int32)
    ref = _prenet_reference(x, prenet.weights_t_pad, seeds, sizes[-1])
    assert jnp.allclose(out, ref, rtol=1e-3, atol=1e-4), float(
        jnp.max(jnp.abs(out - ref)))

    print("KERNEL_OK")
</pallas_src>

<mosaic_0001>
module attributes {stable_mosaic.version = 11 : i64} {
  func.func @_prenet_fused_kernel(%arg0: memref<2xi32, #tpu.memory_space<smem>>, %arg1: memref<8x128xf32, #tpu.memory_space<vmem>>, %arg2: memref<128x128xf32, #tpu.memory_space<vmem>>, %arg3: memref<128x128xf32, #tpu.memory_space<vmem>>, %arg4: memref<8x128xf32, #tpu.memory_space<vmem>>) attributes {dimension_semantics = [], scalar_prefetch = 0 : i64, scratch_operands = 0 : i64, tpu.core_type = #tpu.core_type<tc>} {
    %c0 = arith.constant 0 : index
    %c0_0 = arith.constant 0 : index
    %0 = vector.load %arg1[%c0, %c0_0] : memref<8x128xf32, #tpu.memory_space<vmem>>, vector<8x128xf32>
    %c0_1 = arith.constant 0 : index
    %c0_2 = arith.constant 0 : index
    %1 = vector.load %arg2[%c0_1, %c0_2] : memref<128x128xf32, #tpu.memory_space<vmem>>, vector<128x128xf32>
    %cst = arith.constant dense<0.000000e+00> : vector<8x128xf32>
    %2 = tpu.matmul %0, %1, %cst {dimension_numbers = #tpu.dot_dimension_numbers<[1], [0], [0], [1], [0, 0, 1, 1], [], []>} : vector<8x128xf32>, vector<128x128xf32>, vector<8x128xf32> -> vector<8x128xf32>
    %cst_3 = arith.constant 0.000000e+00 : f32
    %3 = vector.broadcast %cst_3 : f32 to vector<8x128xf32>
    %4 = arith.maximumf %2, %3 : vector<8x128xf32>
    %c0_4 = arith.constant 0 : index
    %5 = memref.load %arg0[%c0_4] : memref<2xi32, #tpu.memory_space<smem>>
    %6 = tpu.iota {dimensions = array<i32: 0>} : vector<8x128xi32>
    %7 = tpu.iota {dimensions = array<i32: 1>} : vector<8x128xi32>
    %c128_i32 = arith.constant 128 : i32
    %8 = vector.broadcast %c128_i32 : i32 to vector<8x128xi32>
    %9 = arith.muli %6, %8 : vector<8x128xi32>
    %10 = arith.addi %9, %7 : vector<8x128xi32>
    %c-1640531527_i32 = arith.constant -1640531527 : i32
    %11 = arith.muli %5, %c-1640531527_i32 : i32
    %12 = vector.broadcast %11 : i32 to vector<8x128xi32>
    %13 = arith.addi %10, %12 : vector<8x128xi32>
    %c16_i32 = arith.constant 16 : i32
    %14 = vector.broadcast %c16_i32 : i32 to vector<8x128xi32>
    %15 = arith.shrui %13, %14 : vector<8x128xi32>
    %16 = arith.xori %13, %15 : vector<8x128xi32>
    %c2146121005_i32 = arith.constant 2146121005 : i32
    %17 = vector.broadcast %c2146121005_i32 : i32 to vector<8x128xi32>
    %18 = arith.muli %16, %17 : vector<8x128xi32>
    %c15_i32 = arith.constant 15 : i32
    %19 = vector.broadcast %c15_i32 : i32 to vector<8x128xi32>
    %20 = arith.shrui %18, %19 : vector<8x128xi32>
    %21 = arith.xori %18, %20 : vector<8x128xi32>
    %c-2073254261_i32 = arith.constant -2073254261 : i32
    %22 = vector.broadcast %c-2073254261_i32 : i32 to vector<8x128xi32>
    %23 = arith.muli %21, %22 : vector<8x128xi32>
    %c16_i32_5 = arith.constant 16 : i32
    %24 = vector.broadcast %c16_i32_5 : i32 to vector<8x128xi32>
    %25 = arith.shrui %23, %24 : vector<8x128xi32>
    %26 = arith.xori %23, %25 : vector<8x128xi32>
    %c31_i32 = arith.constant 31 : i32
    %27 = vector.broadcast %c31_i32 : i32 to vector<8x128xi32>
    %28 = arith.shrui %26, %27 : vector<8x128xi32>
    %c0_i32 = arith.constant 0 : i32
    %29 = vector.broadcast %c0_i32 : i32 to vector<8x128xi32>
    %30 = arith.cmpi eq, %28, %29 : vector<8x128xi32>
    %cst_6 = arith.constant 2.000000e+00 : f32
    %31 = vector.broadcast %cst_6 : f32 to vector<8x128xf32>
    %32 = arith.mulf %4, %31 : vector<8x128xf32>
    %cst_7 = arith.constant 0.000000e+00 : f32
    %33 = vector.broadcast %cst_7 : f32 to vector<8x128xf32>
    %34 = arith.select %30, %32, %33 : vector<8x128xi1>, vector<8x128xf32>
    %c0_8 = arith.constant 0 : index
    %c0_9 = arith.constant 0 : index
    %35 = vector.load %arg3[%c0_8, %c0_9] : memref<128x128xf32, #tpu.memory_space<vmem>>, vector<128x128xf32>
    %cst_10 = arith.constant dense<0.000000e+00> : vector<8x128xf32>
    %36 = tpu.matmul %34, %35, %cst_10 {dimension_numbers = #tpu.dot_dimension_numbers<[1], [0], [0], [1], [0, 0, 1, 1], [], []>} : vector<8x128xf32>, vector<128x128xf32>, vector<8x128xf32> -> vector<8x128xf32>
    %cst_11 = arith.constant 0.000000e+00 : f32
    %37 = vector.broadcast %cst_11 : f32 to vector<8x128xf32>
    %38 = arith.maximumf %36, %37 : vector<8x128xf32>
    %c1 = arith.constant 1 : index
    %39 = memref.load %arg0[%c1] : memref<2xi32, #tpu.memory_space<smem>>
    %40 = tpu.iota {dimensions = array<i32: 0>} : vector<8x128xi32>
    %41 = tpu.iota {dimensions = array<i32: 1>} : vector<8x128xi32>
    %c128_i32_12 = arith.constant 128 : i32
    %42 = vector.broadcast %c128_i32_12 : i32 to vector<8x128xi32>
    %43 = arith.muli %40, %42 : vector<8x128xi32>
    %44 = arith.addi %43, %41 : vector<8x128xi32>
    %c-1640531527_i32_13 = arith.constant -1640531527 : i32
    %45 = arith.muli %39, %c-1640531527_i32_13 : i32
    %46 = vector.broadcast %45 : i32 to vector<8x128xi32>
    %47 = arith.addi %44, %46 : vector<8x128xi32>
    %c16_i32_14 = arith.constant 16 : i32
    %48 = vector.broadcast %c16_i32_14 : i32 to vector<8x128xi32>
    %49 = arith.shrui %47, %48 : vector<8x128xi32>
    %50 = arith.xori %47, %49 : vector<8x128xi32>
    %c2146121005_i32_15 = arith.constant 2146121005 : i32
    %51 = vector.broadcast %c2146121005_i32_15 : i32 to vector<8x128xi32>
    %52 = arith.muli %50, %51 : vector<8x128xi32>
    %c15_i32_16 = arith.constant 15 : i32
    %53 = vector.broadcast %c15_i32_16 : i32 to vector<8x128xi32>
    %54 = arith.shrui %52, %53 : vector<8x128xi32>
    %55 = arith.xori %52, %54 : vector<8x128xi32>
    %c-2073254261_i32_17 = arith.constant -2073254261 : i32
    %56 = vector.broadcast %c-2073254261_i32_17 : i32 to vector<8x128xi32>
    %57 = arith.muli %55, %56 : vector<8x128xi32>
    %c16_i32_18 = arith.constant 16 : i32
    %58 = vector.broadcast %c16_i32_18 : i32 to vector<8x128xi32>
    %59 = arith.shrui %57, %58 : vector<8x128xi32>
    %60 = arith.xori %57, %59 : vector<8x128xi32>
    %c31_i32_19 = arith.constant 31 : i32
    %61 = vector.broadcast %c31_i32_19 : i32 to vector<8x128xi32>
    %62 = arith.shrui %60, %61 : vector<8x128xi32>
    %c0_i32_20 = arith.constant 0 : i32
    %63 = vector.broadcast %c0_i32_20 : i32 to vector<8x128xi32>
    %64 = arith.cmpi eq, %62, %63 : vector<8x128xi32>
    %cst_21 = arith.constant 2.000000e+00 : f32
    %65 = vector.broadcast %cst_21 : f32 to vector<8x128xf32>
    %66 = arith.mulf %38, %65 : vector<8x128xf32>
    %cst_22 = arith.constant 0.000000e+00 : f32
    %67 = vector.broadcast %cst_22 : f32 to vector<8x128xf32>
    %68 = arith.select %64, %66, %67 : vector<8x128xi1>, vector<8x128xf32>
    %c0_23 = arith.constant 0 : index
    %c0_24 = arith.constant 0 : index
    %69 = vector.load %arg4[%c0_23, %c0_24] : memref<8x128xf32, #tpu.memory_space<vmem>>, vector<8x128xf32>
    tpu.vector_store %arg4[%c0_23, %c0_24], %68 {strides = array<i32>} : memref<8x128xf32, #tpu.memory_space<vmem>>, vector<8x128xf32>,
    return
  }
}

</mosaic_0001>

<bundles_post_ra>
// kernel: _prenet_forward.1
= control target key start
LH: loop header
LB: loop body
LE: loop exit
PB: predicated region body
PF: predicated region fallthrough
CT: control target
= control target key end

     0   :  { %9 = vsyncpa [#allocation5], 0  ;;  %s342_s0 = inlined_call_operand.vmem [shape: s32[2], index: 0, kind: input, shape index: {}]   ;;  %s343_s1 = inlined_call_operand.vmem [shape: f32[8,128], index: 1, kind: input, shape index: {}]   ;;  %s344_s2 = inlined_call_operand.hbm [shape: f32[128,128], index: 2, kind: input, shape index: {}]   ;;  %s345_s3 = inlined_call_operand.hbm [shape: f32[128,128], index: 3, kind: input, shape index: {}]   ;;  %s346_s4 = inlined_call_operand.hbm [shape: f32[8,128], index: 4, kind: output, shape index: {}]  }
   0x1   :  { %10 = vsyncpa [#allocation3], 0 }
   0x2   :  { %11 = vsyncpa [#allocation8], 0 }
   0x3   :  { %12 = vsyncpa [#allocation4], 0  ;;  %s18_s17 = sshll.u32 %s342_s0, 4  ;;  %s28_s20 = sshll.u32 %s344_s2, 4  ;;  %s19_s17 = int_to_ptr.vmem [resolvable:$true] %s18_s17  ;;  %s29_s20 = int_to_ptr.hbm [resolvable:$true] %s28_s20 }
   0x4   :  { %s296_s21 = smov [#allocation2]   ;;  %s297_s22 = smov [#allocation6]  }
   0x5   :  { %21 = dma.vmem_to_smem %s19_s17, 16, %s296_s21, [#allocation5]  }
   0x6   :  { %s30_s23 = sshll.u32 %s297_s22, 4  ;;  %s298_s24 = smov 128   ;;  %s31_s23 = int_to_ptr.vmem [resolvable:$true] %s30_s23 }
   0x7   :  { %s299_s25 = smov 8   ;;  %s41_s28 = sshll.u32 %s345_s3, 4  ;;  %s42_s28 = int_to_ptr.hbm [resolvable:$true] %s41_s28 }
   0x8   :  { %36 = dma.hbm_to_vmem [thread:$0]  %s29_s20, 2048, %s31_s23, [#allocation3], %s298_s24, %s298_s24, %s299_s25  }
   0x9   :  { %s300_s0 = smov [#allocation7]  }
   0xa   :  { %s43_s29 = sshll.u32 %s300_s0, 4  ;;  %s44_s29 = int_to_ptr.vmem [resolvable:$true] %s43_s29 }
   0xb   :  { %49 = dma.hbm_to_vmem [thread:$0]  %s42_s28, 2048, %s44_s29, [#allocation8], %s298_s24, %s298_s24, %s299_s25  }
   0xc   :  { %288 = dma.done.wait [#allocation5], 16  }
   0xd   :  { %289 = vsyncadd [#allocation5], 4294967280 }
   0xe   :  { %290 = dma.done.wait [#allocation3], 2048  }
   0xf   :  { %291 = vsyncadd [#allocation3], 4294965248 }
  0x10   :  { %292 = dma.done.wait [#allocation8], 2048  }
  0x11   :  { %293 = vsyncadd [#allocation8], 4294965248 }
  0x12   :  { %62 = sfence }
  0x13   :  { %v79_v0 = vld [vmem:[#allocation6 + $0x78] sm:$0xff]  ;;  %v78_v1 = vld [vmem:[#allocation6 + $0x70] sm:$0xff]  ;;  %v77_v2 = vld [vmem:[#allocation6 + $0x68] sm:$0xff]  ;;  %v102_v30 = vlaneseq  ;;  %s101_s30 = sld [smem:[#allocation2]]  ;;  %s301_s7 = smov [#allocation9]  }
  0x14   :  { %80 = vmatpush.msra.mxu0 %v79_v0  ;;  %v76_v3 = vld [vmem:[#allocation6 + $0x60] sm:$0xff]  ;;  %v138_v4 = vld [vmem:[#allocation7 + $0x78] sm:$0xff]  ;;  %v137_v6 = vld [vmem:[#allocation7 + $0x70] sm:$0xff]  ;;  %s182_s8 = sshll.u32 %s301_s7, 4  ;;  %s184_s11 = sshll.u32 %s346_s4, 4  ;;  %s183_s8 = int_to_ptr.vmem [resolvable:$true] %s182_s8  ;;  %s185_s11 = int_to_ptr.hbm [resolvable:$true] %s184_s11 }
  0x15   :  { %v75_v5 = vld [vmem:[#allocation6 + $0x58] sm:$0xff]  ;;  %139 = vmatpush.msra.mxu1 %v138_v4  ;;  %v136_v7 = vld [vmem:[#allocation7 + $0x68] sm:$0xff]  ;;  %v74_v8 = vld [vmem:[#allocation6 + $0x50] sm:$0xff]  ;;  %v103_v31 = vshrl.u32 %v102_v30, 7  ;;  %v105_v32 = vand.u32 127, %v102_v30 }
  0x16   :  { %81 = vmatpush.msra.mxu0 %v78_v1  ;;  %v135_v9 = vld [vmem:[#allocation7 + $0x60] sm:$0xff]  ;;  %v73_v10 = vld [vmem:[#allocation6 + $0x48] sm:$0xff]  ;;  %v134_v11 = vld [vmem:[#allocation7 + $0x58] sm:$0xff] }
  0x17   :  { %140 = vmatpush.msra.mxu1 %v137_v6  ;;  %v72_v12 = vld [vmem:[#allocation6 + $0x40] sm:$0xff]  ;;  %v133_v13 = vld [vmem:[#allocation7 + $0x50] sm:$0xff]  ;;  %v71_v14 = vld [vmem:[#allocation6 + $0x38] sm:$0xff]  ;;  %v106_v33 = vmul.u32 128, %v103_v31 }
  0x18   :  { %82 = vmatpush.msra.mxu0 %v77_v2  ;;  %v132_v15 = vld [vmem:[#allocation7 + $0x48] sm:$0xff]  ;;  %v70_v16 = vld [vmem:[#allocation6 + $0x30] sm:$0xff]  ;;  %v131_v17 = vld [vmem:[#allocation7 + $0x40] sm:$0xff] }
  0x19   :  { %141 = vmatpush.msra.mxu1 %v136_v7  ;;  %v69_v18 = vld [vmem:[#allocation6 + $0x28] sm:$0xff]  ;;  %v130_v19 = vld [vmem:[#allocation7 + $0x38] sm:$0xff]  ;;  %v68_v20 = vld [vmem:[#allocation6 + $0x20] sm:$0xff]  ;;  %s108_s5 = smul.u32 2654435769, %s101_s30  ;;  %v107_v34 = vadd.s32 %v106_v33, %v105_v32 }
  0x1a   :  { %83 = vmatpush.msra.mxu0 %v76_v3  ;;  %v129_v21 = vld [vmem:[#allocation7 + $0x30] sm:$0xff]  ;;  %v67_v22 = vld [vmem:[#allocation6 + $0x18] sm:$0xff]  ;;  %v128_v23 = vld [vmem:[#allocation7 + $0x28] sm:$0xff] }
  0x1b   :  { %142 = vmatpush.msra.mxu1 %v135_v9  ;;  %v66_v24 = vld [vmem:[#allocation6 + $0x10] sm:$0xff]  ;;  %v127_v25 = vld [vmem:[#allocation7 + $0x20] sm:$0xff]  ;;  %v65_v26 = vld [vmem:[#allocation6 + $0x8] sm:$0xff]  ;;  %v109_v35 = vstv %s108_s5 }
  0x1c   :  { %84 = vmatpush.msra.mxu0 %v75_v5  ;;  %v126_v27 = vld [vmem:[#allocation7 + $0x18] sm:$0xff]  ;;  %v64_v28 = vld [vmem:[#allocation6] sm:$0xff]  ;;  %v110_v36 = vadd.s32 %v109_v35, %v107_v34  ;;  %v125_v38 = vld [vmem:[#allocation7 + $0x10] sm:$0xff] }
  0x1d   :  { %143 = vmatpush.msra.mxu1 %v134_v11  ;;  %v63_v29 = vld [vmem:[%s343_s1] sm:$0xff]  ;;  %v124_v39 = vld [vmem:[#allocation7 + $0x8] sm:$0xff]  ;;  %s197_s1 = sld [smem:[#allocation2 + $0x1]] }
  0x1e   :  { %85 = vmatpush.msra.mxu0 %v74_v8  ;;  %v111_v37 = vshrl.u32 %v110_v36, 16  ;;  %v123_v41 = vld [vmem:[#allocation7] sm:$0xff] }
  0x1f   :  { %144 = vmatpush.msra.mxu1 %v133_v13 }
  0x20   :  { %86 = vmatpush.msra.mxu0 %v73_v10  ;;  %v112_v40 = vxor.u32 %v111_v37, %v110_v36 }
  0x21   :  { %145 = vmatpush.msra.mxu1 %v132_v15 }
  0x22   :  { %87 = vmatpush.msra.mxu0 %v72_v12  ;;  %v113_v42 = vmul.u32 2146121005, %v112_v40 }
  0x23   :  { %146 = vmatpush.msra.mxu1 %v131_v17  ;;  %s161_s6 = smul.u32 2654435769, %s197_s1 }
  0x24   :  { %88 = vmatpush.msra.mxu0 %v71_v14  ;;  %v114_v43 = vshrl.u32 %v113_v42, 15 }
  0x25   :  { %147 = vmatpush.msra.mxu1 %v130_v19  ;;  %v162_v52 = vstv %s161_s6 }
  0x26   :  { %89 = vmatpush.msra.mxu0 %v70_v16  ;;  %v115_v44 = vxor.u32 %v114_v43, %v113_v42  ;;  %v163_v53 = vadd.s32 %v162_v52, %v107_v34 }
  0x27   :  { %148 = vmatpush.msra.mxu1 %v129_v21 }
  0x28   :  { %90 = vmatpush.msra.mxu0 %v69_v18  ;;  %v116_v45 = vmul.u32 2221713035, %v115_v44  ;;  %v164_v54 = vshrl.u32 %v163_v53, 16 }
  0x29   :  { %149 = vmatpush.msra.mxu1 %v128_v23 }
  0x2a   :  { %91 = vmatpush.msra.mxu0 %v68_v20  ;;  %v117_v46 = vshrl.u32 %v116_v45, 16  ;;  %v165_v55 = vxor.u32 %v164_v54, %v163_v53 }
  0x2b   :  { %150 = vmatpush.msra.mxu1 %v127_v25 }
  0x2c   :  { %92 = vmatpush.msra.mxu0 %v67_v22  ;;  %v118_v47 = vxor.u32 %v117_v46, %v116_v45  ;;  %v166_v56 = vmul.u32 2146121005, %v165_v55 }
  0x2d   :  { %151 = vmatpush.msra.mxu1 %v126_v27 }
  0x2e   :  { %93 = vmatpush.msra.mxu0 %v66_v24  ;;  %v119_v48 = vshrl.u32 %v118_v47, 31  ;;  %v167_v57 = vshrl.u32 %v166_v56, 15 }
  0x2f   :  { %152 = vmatpush.msra.mxu1 %v125_v38 }
  0x30   :  { %94 = vmatpush.msra.mxu0 %v65_v26  ;;  %vm120_vm0 = vcmp.eq.s32.totalorder %v119_v48, 0  ;;  %v168_v58 = vxor.u32 %v167_v57, %v166_v56 }
  0x31   :  { %153 = vmatpush.msra.mxu1 %v124_v39 }
  0x32   :  { %95 = vmatpush.msra.mxu0 %v64_v28  ;;  %v169_v59 = vmul.u32 2221713035, %v168_v58 }
  0x33   :  { %96 = vmatmul.f32.vlgmr.msra.gmra.mxu0 %v63_v29  ;;  %154 = vmatpush.msra.mxu1 %v123_v41 }
  0x34   :  { %v170_v60 = vshrl.u32 %v169_v59, 16 }
  0x36   :  { %v171_v61 = vxor.u32 %v170_v60, %v169_v59 }
  0x38   :  { %v172_v62 = vshrl.u32 %v171_v61, 31 }
  0x3a   :  { %vm173_vm1 = vcmp.eq.s32.totalorder %v172_v62, 0 }
  0xb0   :  { %v97_v49 = vpop.f32.mrf.mxu0 }
  0xb1   :  { %v100_v50 = vmax.f32 %v97_v49, 0.0 }
  0xb3   :  { %v121_v51 = vmul.f32 2.0, %v100_v50 }
  0xb5   :  { %196 = vmatmul.msk.f32.vlgmr.msra.gmra.mxu1 %vm120_vm0, %v121_v51 }
 0x132   :  { %v156_v63 = vpop.f32.mrf.mxu1 }
 0x133   :  { %v159_v0 = vmax.f32 %v156_v63, 0.0 }
 0x135   :  { %v174_v1 = vmul.f32 2.0, %v159_v0 }
 0x137   :  { %v175_v2 = vsel %vm173_vm1, %v174_v1, 0.0 }
 0x138   :  { %176 = vst [vmem:[#allocation9] sm:$0xff] %v175_v2 }
 0x139   :  { %187 = dma.vmem_to_hbm [thread:$0]  %s183_s8, 128, %s185_s11, [#allocation4]  }
 0x13a   :  { %294 = dma.done.wait [#allocation4], 128  }
 0x13b   :  { %295 = vsyncadd [#allocation4], 4294967168 }
 0x13c   :  { %192 = vsyncpa [#allocation3], 1 }
 0x13d   :  { %193 = vsyncpa [#allocation8], 1 }
 0x13e   :  { %194 = vsyncpa [#allocation4], 1 }
 0x13f   :  { %195 = vsyncpa [#allocation5], 1 }

</bundles_post_ra>
